<compile_context>
chip_gen: v5e
topology: v5e:2x2
jax: 0.10.0
libtpu: 0.0.40
codegen_flags: <defaults>
</compile_context>

<pallas_src>
import jax
import jax.numpy as jnp
from jax.experimental import pallas as pl
from jax.experimental.pallas import tpu as pltpu

_TARGET_BLOCK_BYTES = 2 * 1024 * 1024  # ~2 MiB per block (safe on all gens)


def _copy_kernel(in_ref, out_ref):
    # Same-shape lane-dense tile copy: pure DMA / vld+vst, no relayout work.
    out_ref[...] = in_ref[...]


def _choose_block(B, F, itemsize, target_bytes=_TARGET_BLOCK_BYTES):
    """Pick (TB, TF) tiles for the [B, F] copy.

    TF: full F, or the largest multiple of 128 that divides F and keeps one
        8-row slab under the byte budget.
    TB: full B, or the largest multiple of 8 that divides B and keeps the
        (TB, TF) block under the byte budget.
    Full-array dims are always legal block dims, so fallbacks stay correct.
    """
    # --- lane (last) dim ---
    tf = F
    if F % 128 == 0:
        max_tf = max(128, ((target_bytes // (8 * itemsize)) // 128) * 128)
        if F > max_tf:
            t = max_tf
            tf = 128
            while t >= 128:
                if F % t == 0:
                    tf = t
                    break
                t -= 128
    # --- sublane (second-to-last) dim ---
    rows_budget = max(1, target_bytes // (tf * itemsize))
    tb = B
    if B > rows_budget and B % 8 == 0:
        t = max(8, (rows_budget // 8) * 8)
        while t >= 8:
            if B % t == 0:
                tb = t
                break
            t -= 8
    return tb, tf


def unflatten(x, channel, height, width, *, donate=False):
    """x: [B, channel*height*width]  ->  [B, channel, height, width]

    Set donate=True only if the caller donates `x` (e.g. jit donate_argnums);
    then the output aliases the input buffer and no second HBM allocation is
    made.
    """
    B, F = x.shape
    assert F == channel * height * width, "flat dim must equal C*H*W"

    itemsize = jnp.dtype(x.dtype).itemsize
    tb, tf = _choose_block(B, F, itemsize)
    grid = (pl.cdiv(B, tb), pl.cdiv(F, tf))

    out2d = pl.pallas_call(
        _copy_kernel,
        out_shape=jax.ShapeDtypeStruct((B, F), x.dtype),
        grid_spec=pltpu.PrefetchScalarGridSpec(
            num_scalar_prefetch=0,
            grid=grid,
            in_specs=[pl.BlockSpec((tb, tf), lambda i, j: (i, j))],
            out_specs=pl.BlockSpec((tb, tf), lambda i, j: (i, j)),
        ),
        compiler_params=pltpu.CompilerParams(
            dimension_semantics=("parallel", "parallel"),
        ),
        cost_estimate=pl.CostEstimate(
            flops=0,
            transcendentals=0,
            bytes_accessed=2 * B * F * itemsize,
        ),
        input_output_aliases=({0: 0} if donate else {}),
    )(x)

    # Metadata-only reshape outside the kernel (PyTorch .view semantics,
    # row-major element order preserved).
    return out2d.reshape(B, channel, height, width)


if __name__ == "__main__":
    # Module config (no learnable parameters in Unflatten)
    C, H, W = 4, 16, 16
    B = 2

    key = jax.random.PRNGKey(0)
    x_flat = jax.random.normal(key, (B, C * H * W), dtype=jnp.float32)

    out = unflatten(x_flat, C, H, W)
    out = jax.block_until_ready(out)

    # Reference: plain reshape (PyTorch .view semantics)
    ref = x_flat.reshape(B, C, H, W)
    assert out.shape == (B, C, H, W)
    assert out.dtype == x_flat.dtype
    assert bool(jnp.array_equal(out, ref))

    print("KERNEL_OK")
</pallas_src>

<mosaic_0001>
module attributes {stable_mosaic.version = 11 : i64} {
  func.func @_copy_kernel(%arg0: i32, %arg1: i32, %arg2: memref<2x1024xf32, #tpu.memory_space<vmem>>, %arg3: memref<2x1024xf32, #tpu.memory_space<vmem>>) attributes {dimension_semantics = [#tpu.dimension_semantics<parallel>, #tpu.dimension_semantics<parallel>], iteration_bounds = array<i64: 1, 1>, scalar_prefetch = 0 : i64, scratch_operands = 0 : i64, tpu.core_type = #tpu.core_type<tc>, window_params = [{transform_indices = @transform_0, window_bounds = array<i64: 2, 1024>}, {transform_indices = @transform_1, window_bounds = array<i64: 2, 1024>}]} {
    %c0 = arith.constant 0 : index
    %c0_0 = arith.constant 0 : index
    %0 = vector.load %arg2[%c0, %c0_0] : memref<2x1024xf32, #tpu.memory_space<vmem>>, vector<2x1024xf32>
    %c0_1 = arith.constant 0 : index
    %c0_2 = arith.constant 0 : index
    %1 = vector.load %arg3[%c0_1, %c0_2] : memref<2x1024xf32, #tpu.memory_space<vmem>>, vector<2x1024xf32>
    tpu.vector_store %arg3[%c0_1, %c0_2], %0 {strides = array<i32>} : memref<2x1024xf32, #tpu.memory_space<vmem>>, vector<2x1024xf32>,
    return
  }
  func.func @transform_0(%arg0: i32, %arg1: i32) -> (i32, i32) {
    %c0_i32 = arith.constant 0 : i32
    return %arg0, %arg1 : i32, i32
  }
  func.func @transform_1(%arg0: i32, %arg1: i32) -> (i32, i32) {
    %c0_i32 = arith.constant 0 : i32
    return %arg0, %arg1 : i32, i32
  }
}

</mosaic_0001>

<bundles_post_ra>
// kernel: tpu_custom_call.1
= control target key start
LH: loop header
LB: loop body
LE: loop exit
PB: predicated region body
PF: predicated region fallthrough
CT: control target
= control target key end

     0   :  { %6 = vsyncpa [#allocation3], 0  ;;  %s116_s0 = inlined_call_operand.hbm [shape: f32[2,1024], index: 0, kind: input, shape index: {}]   ;;  %s117_s1 = inlined_call_operand.hbm [shape: f32[2,1024], index: 1, kind: output, shape index: {}]  }
   0x1   :  { %7 = vsyncpa [#allocation4], 0  ;;  %s13_s8 = sshll.u32 %s116_s0, 4  ;;  %s98_s9 = smov [#allocation2]   ;;  %s14_s8 = int_to_ptr.hbm [resolvable:$true] %s13_s8 }
   0x2   :  { %s15_s10 = sshll.u32 %s98_s9, 4  ;;  %s16_s10 = int_to_ptr.vmem [resolvable:$true] %s15_s10 }
   0x3   :  { %18 = dma.hbm_to_vmem [thread:$0]  %s14_s8, 256, %s16_s10, [#allocation3]  }
   0x4   :  { %94 = dma.done.wait [#allocation3], 256  }
   0x5   :  { %95 = vsyncadd [#allocation3], 4294967040  ;;  %s99_s11 = smov [#allocation5]   ;;  %s34_s15 = sshll.u32 %s117_s1, 4  ;;  %v23_v0 = vld [vmem:[#allocation2] sm:$0xff]  ;;  %v24_v1 = vld [vmem:[#allocation2 + $0x8] sm:$0xff]  ;;  %s35_s15 = int_to_ptr.hbm [resolvable:$true] %s34_s15 }
   0x6   :  { %s32_s12 = sshll.u32 %s99_s11, 4  ;;  %25 = vst [vmem:[#allocation5] sm:$0xff] %v23_v0  ;;  %s33_s12 = int_to_ptr.vmem [resolvable:$true] %s32_s12 }
   0x7   :  { %26 = vst [vmem:[#allocation5 + $0x8] sm:$0xff] %v24_v1 }
   0x8   :  { %37 = dma.vmem_to_hbm [thread:$0]  %s33_s12, 256, %s35_s15, [#allocation4]  }
   0x9   :  { %96 = dma.done.wait [#allocation4], 256  }
   0xa   :  { %97 = vsyncadd [#allocation4], 4294967040 }
   0xb   :  { %42 = vsyncpa [#allocation3], 1 }
   0xc   :  { %43 = vsyncpa [#allocation4], 1 }

</bundles_post_ra>
